<compile_context>
chip_gen: v6e
topology: v6e:2x2x1
jax: 0.10.0
libtpu: 0.0.40
codegen_flags: <defaults>
</compile_context>

<pallas_src>
import functools

import jax
import jax.numpy as jnp
from jax.experimental import pallas as pl
from jax.experimental.pallas import tpu as pltpu

LANE = 128
SUBLANE = 8


def _round_up(x, m):
    return (x + m - 1) // m * m


def _node_inference_kernel(depth, g_ref, node_ref, *refs):
    """refs = (Wg, bg, W1, b1, ..., Wd, bd, out_ref).

    g_ref    : (TM, Np)   bf16  row-block of the padded adjacency
    node_ref : (Np, Fp)   bf16  padded node features (grid-resident)
    weights  : bf16 [in, out] padded to 128-lane multiples, biases f32 [1, out]
    out_ref  : (TM, OUTp) f32   lane-dense output block
    """
    out_ref = refs[-1]
    params = refs[:-1]

    # ---- graph model: one GCN layer (neighbor aggregation + linear + ReLU) ----
    agg = jnp.dot(g_ref[...], node_ref[...], preferred_element_type=jnp.float32)
    wg, bg = params[0], params[1]
    x = jnp.dot(agg.astype(jnp.bfloat16), wg[...],
                preferred_element_type=jnp.float32) + bg[...]
    x = jnp.maximum(x, 0.0)

    # ---- MLP head: Linear layers, ReLU between hidden layers only ------------
    idx = 2
    for i in range(depth):
        w, b = params[idx], params[idx + 1]
        idx += 2
        x = jnp.dot(x.astype(jnp.bfloat16), w[...],
                    preferred_element_type=jnp.float32) + b[...]
        if i < depth - 1:
            x = jnp.maximum(x, 0.0)

    out_ref[...] = x.astype(out_ref.dtype)


def _pad2d(a, rows, cols, dtype):
    r, c = a.shape
    return jnp.pad(a, ((0, rows - r), (0, cols - c))).astype(dtype)


def node_inference_forward(node_seq, G, params, *, depth, num_outs, tm=128):
    """params: flat tuple (Wg, bg, W1, b1, ..., Wd, bd); weights stored [in, out]
    so the kernel computes x @ W + b (== PyTorch x @ W.T + b)."""
    N, F = node_seq.shape

    # ---- pad to MXU/lane-native shapes (zeros do not change the math) --------
    tm = _round_up(tm, SUBLANE)
    Np = _round_up(N, max(tm, LANE))          # node axis (rows of G and X, cols of G)
    Fp = _round_up(F, LANE)
    OUTp = _round_up(num_outs, LANE)

    g_pad = _pad2d(G, Np, Np, jnp.bfloat16)
    x_pad = _pad2d(node_seq, Np, Fp, jnp.bfloat16)

    padded_params = []
    feat_dims = []                            # (in, out) per linear, padded
    for li in range(len(params) // 2):
        w, b = params[2 * li], params[2 * li + 1]
        ip, op = _round_up(w.shape[0], LANE), _round_up(w.shape[1], LANE)
        padded_params.append(_pad2d(w, ip, op, jnp.bfloat16))
        padded_params.append(_pad2d(b, 1, op, jnp.float32))
        feat_dims.append((ip, op))

    # ---- grid over node rows; weights / node features stay resident ----------
    grid = (Np // tm,)
    in_specs = [
        pl.BlockSpec((tm, Np), lambda i: (i, 0)),     # G row-block (streamed)
        pl.BlockSpec((Np, Fp), lambda i: (0, 0)),     # node features (resident)
    ]
    for p in padded_params:
        in_specs.append(pl.BlockSpec(p.shape, lambda i: (0, 0)))
    out_spec = pl.BlockSpec((tm, OUTp), lambda i: (i, 0))

    # ---- cost estimate + VMEM budget (double-buffered block footprint) -------
    flops = 2 * Np * Np * Fp + sum(2 * Np * ip * op for ip, op in feat_dims)
    bytes_accessed = (g_pad.size * 2 + x_pad.size * 2 + Np * OUTp * 4
                      + sum(p.size * p.dtype.itemsize for p in padded_params))
    cost = pl.CostEstimate(flops=flops, transcendentals=0,
                           bytes_accessed=bytes_accessed)

    block_bytes = (tm * Np * 2 + Np * Fp * 2 + tm * OUTp * 4
                   + sum(p.size * p.dtype.itemsize for p in padded_params))
    vmem_limit = int(min(max(2 * block_bytes + (8 << 20), 16 << 20), 48 << 20))

    kernel = functools.partial(_node_inference_kernel, depth)
    out_padded = pl.pallas_call(
        kernel,
        grid=grid,
        in_specs=in_specs,
        out_specs=out_spec,
        out_shape=jax.ShapeDtypeStruct((Np, OUTp), jnp.float32),
        compiler_params=pltpu.CompilerParams(
            dimension_semantics=("parallel",),
            vmem_limit_bytes=vmem_limit),
        cost_estimate=cost,
    )(g_pad, x_pad, *padded_params)

    return out_padded[:N, :num_outs]


def _linear_init(key, fan_in, fan_out):
    """PyTorch nn.Linear default init, weight returned as [in, out]."""
    kw, kb = jax.random.split(key)
    bound = 1.0 / (fan_in ** 0.5)
    w = jax.random.uniform(kw, (fan_in, fan_out), jnp.float32, -bound, bound)
    b = jax.random.uniform(kb, (1, fan_out), jnp.float32, -bound, bound)
    return w, b


def _reference(node_seq, G, params, depth):
    """Pure-JAX reference with the same bf16-in / f32-accumulate numerics."""
    bf = jnp.bfloat16
    x = jnp.dot(G.astype(bf), node_seq.astype(bf),
                preferred_element_type=jnp.float32)
    x = jnp.dot(x.astype(bf), params[0].astype(bf),
                preferred_element_type=jnp.float32) + params[1]
    x = jnp.maximum(x, 0.0)
    idx = 2
    for i in range(depth):
        w, b = params[idx], params[idx + 1]
        idx += 2
        x = jnp.dot(x.astype(bf), w.astype(bf),
                    preferred_element_type=jnp.float32) + b
        if i < depth - 1:
            x = jnp.maximum(x, 0.0)
    return x


if __name__ == "__main__":
    # Small shapes consistent with the module's forward (row-tiled: 2 grid steps).
    N = 256          # number of nodes
    F = 8            # input node-feature dim
    GRAPH_OUTS = 16  # graph_model output feature dim
    HIDDEN = 32      # hidden_size of the head
    NUM_OUTS = 4     # num_outs
    DEPTH = 2        # head depth: Linear -> ReLU -> Linear
    TM = 128         # node-row tile

    key = jax.random.PRNGKey(0)
    k_x, k_g, k_wg, k_h = jax.random.split(key, 4)

    node_seq = jax.random.normal(k_x, (N, F), jnp.float32)
    # Symmetric, self-looped, row-normalized adjacency.
    A = (jax.random.uniform(k_g, (N, N)) < 0.05).astype(jnp.float32)
    A = jnp.clip(A + A.T + jnp.eye(N, dtype=jnp.float32), 0.0, 1.0)
    G = A / jnp.sum(A, axis=1, keepdims=True)

    # Parameters (deterministic init): graph-model linear + head linears.
    params = []
    wg, bg = _linear_init(k_wg, F, GRAPH_OUTS)
    params += [wg, bg]
    sizes_in = [GRAPH_OUTS if i == 0 else HIDDEN for i in range(DEPTH)]
    sizes_out = [HIDDEN if i < DEPTH - 1 else NUM_OUTS for i in range(DEPTH)]
    hk = jax.random.split(k_h, DEPTH)
    for i in range(DEPTH):
        w, b = _linear_init(hk[i], sizes_in[i], sizes_out[i])
        params += [w, b]
    params = tuple(params)

    out = node_inference_forward(node_seq, G, params,
                                 depth=DEPTH, num_outs=NUM_OUTS, tm=TM)
    out = jax.block_until_ready(out)

    ref = _reference(node_seq, G, params, DEPTH)
    assert out.shape == (N, NUM_OUTS)
    assert jnp.allclose(out, ref, atol=2e-3, rtol=2e-3), (
        float(jnp.max(jnp.abs(out - ref))))

    print("KERNEL_OK")
</pallas_src>

<mosaic_0001>
module attributes {stable_mosaic.version = 11 : i64} {
  func.func @_node_inference_kernel(%arg0: i32, %arg1: memref<128x256xbf16, #tpu.memory_space<vmem>>, %arg2: memref<256x128xbf16, #tpu.memory_space<vmem>>, %arg3: memref<128x128xbf16, #tpu.memory_space<vmem>>, %arg4: memref<1x128xf32, #tpu.memory_space<vmem>>, %arg5: memref<128x128xbf16, #tpu.memory_space<vmem>>, %arg6: memref<1x128xf32, #tpu.memory_space<vmem>>, %arg7: memref<128x128xbf16, #tpu.memory_space<vmem>>, %arg8: memref<1x128xf32, #tpu.memory_space<vmem>>, %arg9: memref<128x128xf32, #tpu.memory_space<vmem>>) attributes {dimension_semantics = [#tpu.dimension_semantics<parallel>], iteration_bounds = array<i64: 2>, scalar_prefetch = 0 : i64, scratch_operands = 0 : i64, tpu.core_type = #tpu.core_type<tc>, window_params = [{transform_indices = @transform_0, window_bounds = array<i64: 128, 256>}, {pipeline_mode = #tpu.pipeline_mode<synchronous>, transform_indices = @transform_1, window_bounds = array<i64: 256, 128>}, {pipeline_mode = #tpu.pipeline_mode<synchronous>, transform_indices = @transform_2, window_bounds = array<i64: 128, 128>}, {pipeline_mode = #tpu.pipeline_mode<synchronous>, transform_indices = @transform_3, window_bounds = array<i64: 1, 128>}, {pipeline_mode = #tpu.pipeline_mode<synchronous>, transform_indices = @transform_4, window_bounds = array<i64: 128, 128>}, {pipeline_mode = #tpu.pipeline_mode<synchronous>, transform_indices = @transform_5, window_bounds = array<i64: 1, 128>}, {pipeline_mode = #tpu.pipeline_mode<synchronous>, transform_indices = @transform_6, window_bounds = array<i64: 128, 128>}, {pipeline_mode = #tpu.pipeline_mode<synchronous>, transform_indices = @transform_7, window_bounds = array<i64: 1, 128>}, {transform_indices = @transform_8, window_bounds = array<i64: 128, 128>}]} {
    %c0 = arith.constant 0 : index
    %c0_0 = arith.constant 0 : index
    %0 = vector.load %arg1[%c0, %c0_0] : memref<128x256xbf16, #tpu.memory_space<vmem>>, vector<128x256xbf16>
    %c0_1 = arith.constant 0 : index
    %c0_2 = arith.constant 0 : index
    %1 = vector.load %arg2[%c0_1, %c0_2] : memref<256x128xbf16, #tpu.memory_space<vmem>>, vector<256x128xbf16>
    %cst = arith.constant dense<0.000000e+00> : vector<128x128xf32>
    %2 = tpu.matmul %0, %1, %cst {dimension_numbers = #tpu.dot_dimension_numbers<[1], [0], [0], [1], [0, 0, 1, 1], [], []>} : vector<128x256xbf16>, vector<256x128xbf16>, vector<128x128xf32> -> vector<128x128xf32>
    %3 = arith.truncf %2 : vector<128x128xf32> to vector<128x128xbf16>
    %c0_3 = arith.constant 0 : index
    %c0_4 = arith.constant 0 : index
    %4 = vector.load %arg3[%c0_3, %c0_4] : memref<128x128xbf16, #tpu.memory_space<vmem>>, vector<128x128xbf16>
    %cst_5 = arith.constant dense<0.000000e+00> : vector<128x128xf32>
    %5 = tpu.matmul %3, %4, %cst_5 {dimension_numbers = #tpu.dot_dimension_numbers<[1], [0], [0], [1], [0, 0, 1, 1], [], []>} : vector<128x128xbf16>, vector<128x128xbf16>, vector<128x128xf32> -> vector<128x128xf32>
    %c0_6 = arith.constant 0 : index
    %c0_7 = arith.constant 0 : index
    %6 = vector.load %arg4[%c0_6, %c0_7] : memref<1x128xf32, #tpu.memory_space<vmem>>, vector<1x128xf32>
    %7 = vector.broadcast %6 : vector<1x128xf32> to vector<128x128xf32>
    %8 = arith.addf %5, %7 : vector<128x128xf32>
    %cst_8 = arith.constant 0.000000e+00 : f32
    %9 = vector.broadcast %cst_8 : f32 to vector<128x128xf32>
    %10 = arith.maximumf %8, %9 : vector<128x128xf32>
    %11 = arith.truncf %10 : vector<128x128xf32> to vector<128x128xbf16>
    %c0_9 = arith.constant 0 : index
    %c0_10 = arith.constant 0 : index
    %12 = vector.load %arg5[%c0_9, %c0_10] : memref<128x128xbf16, #tpu.memory_space<vmem>>, vector<128x128xbf16>
    %cst_11 = arith.constant dense<0.000000e+00> : vector<128x128xf32>
    %13 = tpu.matmul %11, %12, %cst_11 {dimension_numbers = #tpu.dot_dimension_numbers<[1], [0], [0], [1], [0, 0, 1, 1], [], []>} : vector<128x128xbf16>, vector<128x128xbf16>, vector<128x128xf32> -> vector<128x128xf32>
    %c0_12 = arith.constant 0 : index
    %c0_13 = arith.constant 0 : index
    %14 = vector.load %arg6[%c0_12, %c0_13] : memref<1x128xf32, #tpu.memory_space<vmem>>, vector<1x128xf32>
    %15 = vector.broadcast %14 : vector<1x128xf32> to vector<128x128xf32>
    %16 = arith.addf %13, %15 : vector<128x128xf32>
    %cst_14 = arith.constant 0.000000e+00 : f32
    %17 = vector.broadcast %cst_14 : f32 to vector<128x128xf32>
    %18 = arith.maximumf %16, %17 : vector<128x128xf32>
    %19 = arith.truncf %18 : vector<128x128xf32> to vector<128x128xbf16>
    %c0_15 = arith.constant 0 : index
    %c0_16 = arith.constant 0 : index
    %20 = vector.load %arg7[%c0_15, %c0_16] : memref<128x128xbf16, #tpu.memory_space<vmem>>, vector<128x128xbf16>
    %cst_17 = arith.constant dense<0.000000e+00> : vector<128x128xf32>
    %21 = tpu.matmul %19, %20, %cst_17 {dimension_numbers = #tpu.dot_dimension_numbers<[1], [0], [0], [1], [0, 0, 1, 1], [], []>} : vector<128x128xbf16>, vector<128x128xbf16>, vector<128x128xf32> -> vector<128x128xf32>
    %c0_18 = arith.constant 0 : index
    %c0_19 = arith.constant 0 : index
    %22 = vector.load %arg8[%c0_18, %c0_19] : memref<1x128xf32, #tpu.memory_space<vmem>>, vector<1x128xf32>
    %23 = vector.broadcast %22 : vector<1x128xf32> to vector<128x128xf32>
    %24 = arith.addf %21, %23 : vector<128x128xf32>
    %c0_20 = arith.constant 0 : index
    %c0_21 = arith.constant 0 : index
    %25 = vector.load %arg9[%c0_20, %c0_21] : memref<128x128xf32, #tpu.memory_space<vmem>>, vector<128x128xf32>
    tpu.vector_store %arg9[%c0_20, %c0_21], %24 {strides = array<i32>} : memref<128x128xf32, #tpu.memory_space<vmem>>, vector<128x128xf32>,
    return
  }
  func.func @transform_0(%arg0: i32) -> (i32, i32) {
    %c0_i32 = arith.constant 0 : i32
    %c0_i32_0 = arith.constant 0 : i32
    return %arg0, %c0_i32 : i32, i32
  }
  func.func @transform_1(%arg0: i32) -> (i32, i32) {
    %c0_i32 = arith.constant 0 : i32
    %c0_i32_0 = arith.constant 0 : i32
    %c0_i32_1 = arith.constant 0 : i32
    return %c0_i32, %c0_i32_0 : i32, i32
  }
  func.func @transform_2(%arg0: i32) -> (i32, i32) {
    %c0_i32 = arith.constant 0 : i32
    %c0_i32_0 = arith.constant 0 : i32
    %c0_i32_1 = arith.constant 0 : i32
    return %c0_i32, %c0_i32_0 : i32, i32
  }
  func.func @transform_3(%arg0: i32) -> (i32, i32) {
    %c0_i32 = arith.constant 0 : i32
    %c0_i32_0 = arith.constant 0 : i32
    %c0_i32_1 = arith.constant 0 : i32
    return %c0_i32, %c0_i32_0 : i32, i32
  }
  func.func @transform_4(%arg0: i32) -> (i32, i32) {
    %c0_i32 = arith.constant 0 : i32
    %c0_i32_0 = arith.constant 0 : i32
    %c0_i32_1 = arith.constant 0 : i32
    return %c0_i32, %c0_i32_0 : i32, i32
  }
  func.func @transform_5(%arg0: i32) -> (i32, i32) {
    %c0_i32 = arith.constant 0 : i32
    %c0_i32_0 = arith.constant 0 : i32
    %c0_i32_1 = arith.constant 0 : i32
    return %c0_i32, %c0_i32_0 : i32, i32
  }
  func.func @transform_6(%arg0: i32) -> (i32, i32) {
    %c0_i32 = arith.constant 0 : i32
    %c0_i32_0 = arith.constant 0 : i32
    %c0_i32_1 = arith.constant 0 : i32
    return %c0_i32, %c0_i32_0 : i32, i32
  }
  func.func @transform_7(%arg0: i32) -> (i32, i32) {
    %c0_i32 = arith.constant 0 : i32
    %c0_i32_0 = arith.constant 0 : i32
    %c0_i32_1 = arith.constant 0 : i32
    return %c0_i32, %c0_i32_0 : i32, i32
  }
  func.func @transform_8(%arg0: i32) -> (i32, i32) {
    %c0_i32 = arith.constant 0 : i32
    %c0_i32_0 = arith.constant 0 : i32
    return %arg0, %c0_i32 : i32, i32
  }
}

</mosaic_0001>

<bundles_post_ra>
// kernel: tpu_custom_call.1
= control target key start
LH: loop header
LB: loop body
LE: loop exit
PB: predicated region body
PF: predicated region fallthrough
CT: control target
= control target key end

     0   :  { %s2425_s0 = inlined_call_operand.hbm [shape: bf16[256,256], index: 0, kind: input, shape index: {}]   ;;  %s2426_s1 = inlined_call_operand.hbm [shape: bf16[256,128], index: 1, kind: input, shape index: {}]   ;;  %s2427_s2 = inlined_call_operand.hbm [shape: bf16[128,128], index: 2, kind: input, shape index: {}]   ;;  %s2428_s3 = inlined_call_operand.vmem [shape: f32[1,128], index: 3, kind: input, shape index: {}]   ;;  %s2429_s4 = inlined_call_operand.hbm [shape: bf16[128,128], index: 4, kind: input, shape index: {}]   ;;  %s2430_s5 = inlined_call_operand.vmem [shape: f32[1,128], index: 5, kind: input, shape index: {}]   ;;  %s2431_s6 = inlined_call_operand.hbm [shape: bf16[128,128], index: 6, kind: input, shape index: {}]   ;;  %s2432_s7 = inlined_call_operand.vmem [shape: f32[1,128], index: 7, kind: input, shape index: {}]   ;;  %s2433_s8 = inlined_call_operand.hbm [shape: f32[256,128], index: 8, kind: output, shape index: {}]  }
   0x1   :  { %2438 = sst [smem:[#allocation16_spill]] %s2426_s1 }
   0x2   :  { %2439 = sst [smem:[#allocation17_spill]] %s2427_s2 }
   0x3   :  { %13 = vsyncpa [#allocation3], 0 }
   0x4   :  { %15 = vsyncpa [#allocation3 + $0x1], 0 }
   0x5   :  { %16 = vsyncpa [#allocation6], 0 }
   0x6   :  { %17 = vsyncpa [#allocation9], 0 }
   0x7   :  { %18 = vsyncpa [#allocation4], 0 }
   0x8   :  { %20 = vsyncpa [#allocation4 + $0x1], 0  ;;  %s2137_s27 = smov 0   ;;  %s2139_s28 = smov 0  }
   0x9   :  { %s2141_s29 = smov 0   ;;  %s2143_s30 = smov 0  }
   0xa LB: > { %s2158_s9 = sadd.s32 4294967295, %s2078_s30   ;;  %s1408_s10 = sadd.s32 4294967294, %s2078_s30   ;;  %s2078_s30 = sphi %s2143_s30, %s2460_s30   ;;  %s2074_s29 = sphi %s2141_s29, %s2459_s29   ;;  %s2070_s28 = sphi %s2139_s28, %s2458_s28   ;;  %s2066_s27 = sphi %s2137_s27, %s2457_s27  }
   0xb   : > { %p46_p0 = scmp.ne.s32.totalorder %s2070_s28, %s2066_s27  ;;  %p2434_p1 = scmp.eq.s32.totalorder %s2158_s9, 0 }
   0xc   : > { %p217_p2 = scmp.eq.s32.totalorder %s2158_s9, 1  ;;  %p223_p3 = scmp.eq.s32.totalorder %s1408_s10, 1 }
   0xd   : > { %p2167_p4 = por %p2434_p1, %p46_p0  ;;  %p1409_p5 = scmp.ge.s32.totalorder %s2078_s30, 1 }
   0xe   : > { %p2172_p6 = por %p223_p3, %p46_p0  ;;  %p230_p7 = scmp.lt.s32.totalorder %s2078_s30, 3 }
   0xf   : > { %s2440_s11 = scalar_select %p2167_p4, 1, 0 }
  0x10   : > { %s2441_s12 = scalar_select %p2172_p6, 1, 0 }
  0x11   : > { %p2177_p8 = pnand %p1409_p5, %p230_p7  ;;  %s2080_s14 = smov [#allocation5]  }
  0x12   : > { %s242_s15 = sshll.u32 %s2080_s14, 4  ;;  %s2081_s17 = smov [#allocation8]   ;;  %s243_s15 = int_to_ptr.vmem [resolvable:$true] %s242_s15 }
  0x13   : > { %s2442_s13 = scalar_select %p2177_p8, 1, 0 }
  0x14   : > { %p1737_p9 = pneg %p2177_p8  ;;  %s271_s18 = sshll.u32 %s2081_s17, 4  ;;  %s272_s18 = int_to_ptr.vmem [resolvable:$true] %s271_s18 }
  0x15   : > { %s2082_s19 = smov [#allocation7]   ;;  %s1885_s21 = scalar_lea.vmem %s243_s15, 2048 }
  0x16   : > { %p2186_p11 = pnand %p1737_p9, %p2434_p1  ;;  %s255_s20 = sshll.u32 %s2082_s19, 4  ;;  %s256_s20 = int_to_ptr.vmem [resolvable:$true] %s255_s20 }
  0x17   : > { %p1886_p13 = scmp.ne.s32.totalorder %s243_s15, %s1885_s21  ;;  %p1893_p5 = scmp.lt.s32.totalorder %s243_s15, %s243_s15 }
  0x18   : > { %p1876_p12 = pneg %p2186_p11  ;;  %p1894_p7 = scmp.lt.s32.totalorder %s1885_s21, %s1885_s21 }
  0x1a   : > { %p1888_p0 = pnand %p1886_p13, %p1876_p12  ;;  %p1895_p9 = por %p1894_p7, %p1893_p5 }
  0x1c   : > { %p1889_p3 = pneg %p1888_p0 }
  0x1e   : > { %p1896_p10 = pnand %p1895_p9, %p1889_p3 }
  0x20   : > { %1899 = shalt.err (!%p1896_p10)
}
  0x21   : > { %s2083_s22 = smov 64   ;;  %s2084_s23 = smov 4  }
  0x22   : > { %s2444_s1 = sld [smem:[#allocation16_spill]]  ;;  %s1911_s26 = scalar_lea.vmem %s272_s18, 1024 }
  0x23   : > { %p1912_p13 = scmp.ne.s32.totalorder %s272_s18, %s1911_s26  ;;  %p1919_p3 = scmp.lt.s32.totalorder %s272_s18, %s272_s18 }
  0x24   : > { %p1920_p10 = scmp.lt.s32.totalorder %s1911_s26, %s1911_s26 }
  0x25   : > { %p1914_p0 = pnand %p1912_p13, %p1876_p12 }
  0x26   : > { %p1921_p7 = por %p1920_p10, %p1919_p3 }
  0x27   : > { %p1915_p5 = pneg %p1914_p0 }
  0x28   : > { %1740 = dma.hbm_to_vmem [thread:$0]  (!%p2186_p11), %s2444_s1, 2048, %s243_s15, [#allocation6], %s2083_s22, %s2083_s22, %s2084_s23  }
  0x29   : > { %p1922_p9 = pnand %p1921_p7, %p1915_p5 }
  0x2b   : > { %1925 = shalt.err (!%p1922_p9)
}
  0x2c   : > { %1746 = dma.hbm_to_vmem [thread:$0]  (!%p2186_p11), %s2429_s4, 1024, %s272_s18, [#allocation9], %s2083_s22, %s2083_s22, %s2084_s23  }
  0x2d   : > { %s1937_s15 = scalar_lea.vmem %s256_s20, 1024  ;;  %p1945_p3 = scmp.lt.s32.totalorder %s256_s20, %s256_s20 }
  0x2e   : > { %p1938_p1 = scmp.ne.s32.totalorder %s256_s20, %s1937_s15  ;;  %p1946_p5 = scmp.lt.s32.totalorder %s1937_s15, %s1937_s15 }
  0x30   : > { %p1940_p13 = pnand %p1938_p1, %p1876_p12  ;;  %p1947_p10 = por %p1946_p5, %p1945_p3 }
  0x32   : > { %p1941_p0 = pneg %p1940_p13 }
  0x34   : > { %p1948_p7 = pnand %p1947_p10, %p1941_p0 }
  0x36   : > { %1951 = shalt.err (!%p1948_p7)
}
  0x37   : > { %s2445_s2 = sld [smem:[#allocation17_spill]]  ;;  %s2085_s18 = smov [#allocation10]  }
  0x38   : > { %s287_s21 = sshll.u32 %s2085_s18, 4  ;;  %s288_s21 = int_to_ptr.vmem [resolvable:$true] %s287_s21 }
  0x39   : > { %s1963_s24 = scalar_lea.vmem %s288_s21, 1024  ;;  %p1971_p0 = scmp.lt.s32.totalorder %s288_s21, %s288_s21 }
  0x3a   : > { %p1964_p1 = scmp.ne.s32.totalorder %s288_s21, %s1963_s24  ;;  %p1972_p3 = scmp.lt.s32.totalorder %s1963_s24, %s1963_s24 }
  0x3c   : > { %p1966_p9 = pnand %p1964_p1, %p1876_p12  ;;  %p1973_p5 = por %p1972_p3, %p1971_p0 }
  0x3d   : > { %1743 = dma.hbm_to_vmem [thread:$0]  (!%p2186_p11), %s2445_s2, 1024, %s256_s20, [#allocation6], %s2083_s22, %s2083_s22, %s2084_s23  }
  0x3e   : > { %p1967_p13 = pneg %p1966_p9 }
  0x40   : > { %p1974_p10 = pnand %p1973_p5, %p1967_p13 }
  0x42   : > { %1977 = shalt.err (!%p1974_p10)
}
  0x43   : > { %1749 = dma.hbm_to_vmem [thread:$0]  (!%p2186_p11), %s2431_s6, 1024, %s288_s21, [#allocation9], %s2083_s22, %s2083_s22, %s2084_s23  }
  0x44   : > { %s2237_s26 = sadd.s32 1, %s2078_s30   ;;  %s33_s16 = sadd.s32 1, %s2074_s29 }
  0x45   : > { %s30_s10 = ssub.s32 %s2078_s30, %s2237_s26  ;;  %p40_p12 = scmp.ne.s32.totalorder %s2074_s29, %s2070_s28 }
  0x46   : > { %p31_p7 = scmp.eq.s32.totalorder %s30_s10, 0  ;;  %p41_p1 = scmp.eq.s32.totalorder %s2078_s30, 0 }
  0x47   : > { %p2247_p9 = por %p217_p2, %p40_p12  ;;  %p1762_p13 = scmp.lt.s32.totalorder %s2078_s30, 2 }
  0x48   : > { %s2253_s15 = scalar_select %p31_p7, %s2074_s29, %s33_s16  }
  0x49   : > { %s2446_s14 = scalar_select %p2247_p9, 1, 0 }
  0x4a   : > { %p42_p0 = por %p41_p1, %p40_p12  ;;  %s304_s17 = sand.u32 1, %s2074_s29  }
  0x4b   : > { %s1415_s19 = sshll.u32 %s304_s17, 7  ;;  %s1491_s22 = sshll.u32 %s2078_s30, 11 }
  0x4c   : > { %s2260_s21 = scalar_lea.hbm %s2425_s0, %s1491_s22  ;;  %s308_s24 = scalar_lea.vmem [#allocation2], %s1415_s19 }
  0x4d   : > { %s316_s20 = sshll.u32 %s308_s24, 4  ;;  %p2264_p2 = pnand %p1762_p13, %p42_p0  ;;  %s2262_s20 = int_to_ptr.vmem [resolvable:$true] %s316_s20 }
  0x4e   : > { %s2268_s16 = scalar_lea.sflag [#allocation3], %s304_s17  ;;  %s1978_s10 = scalar_lea.hbm %s2260_s21, 2048 }
  0x4f   : > { %p1979_p11 = scmp.ne.s32.totalorder %s2260_s21, %s1978_s10  ;;  %p1980_p3 = pneg %p2264_p2 }
  0x50   : > { %s1983_s19 = scalar_lea.hbm %s2425_s0, 4096  ;;  %p1984_p12 = scmp.lt.s32.totalorder %s2260_s21, %s2425_s0 }
  0x51   : > { %p1981_p5 = pnand %p1980_p3, %p1979_p11  ;;  %p1985_p7 = scmp.lt.s32.totalorder %s1983_s19, %s1978_s10 }
  0x53   : > { %p1982_p10 = pneg %p1981_p5  ;;  %p1986_p1 = por %p1985_p7, %p1984_p12 }
  0x55   : > { %p1987_p13 = pnand %p1986_p1, %p1982_p10 }
  0x57   : > { %1990 = shalt.err (!%p1987_p13)
}
  0x58   : > { %s1991_s17 = scalar_lea.vmem %s2262_s20, 2048  ;;  %s2086_s1 = smov [#allocation2]  }
  0x59   : > { %p1992_p0 = scmp.ne.s32.totalorder %s2262_s20, %s1991_s17  ;;  %s1996_s2 = sshll.u32 %s2086_s1, 4  ;;  %s1997_s2 = int_to_ptr.vmem [resolvable:$false] %s1996_s2 }
  0x5a   : > { %s1998_s22 = scalar_lea.vmem %s1997_s2, 4096  ;;  %p1999_p5 = scmp.lt.s32.totalorder %s2262_s20, %s1997_s2 }
  0x5b   : > { %p1994_p6 = pnand %p1992_p0, %p1980_p3  ;;  %p2000_p9 = scmp.lt.s32.totalorder %s1998_s22, %s1991_s17 }
  0x5d   : > { %p1995_p11 = pneg %p1994_p6  ;;  %p2001_p4 = por %p2000_p9, %p1999_p5 }
  0x5f   : > { %p2002_p8 = pnand %p2001_p4, %p1995_p11 }
  0x61   : > { %2005 = shalt.err (!%p2002_p8)
}
  0x62   : > { %s2087_s10 = smov 128   ;;  %s2088_s23 = smov 8  }
  0x63   : > { %1753 = dma.hbm_to_vmem [thread:$0]  (!%p2264_p2), %s2260_s21, 2048, %s2262_s20, %s2268_s16, %s2087_s10, %s2087_s10, %s2088_s23  }
  0x64   : > { %p2448_p3 = scmp.ne.s32.totalorder %s2442_s13, 0 }
  0x65   : > { %s2292_s1 = sand.u32 (!%p2448_p3), 1, %s2070_s28   ;;  %p2449_p4 = scmp.ne.s32.totalorder (!%p2448_p3), %s2440_s11, 0 }
  0x66   : > { %328 = sbr.rel (%p2448_p3) target bundleno = 1033 (0x409), region = 52  ;;  %s1420_s2 = sshll.u32 (!%p2448_p3), %s2292_s1, 7 }
  0x67   : > { %s331_s19 = scalar_lea.sflag (!%p2448_p3), [#allocation3], %s2292_s1  ;;  %s2298_s18 = scalar_lea.vmem (!%p2448_p3), [#allocation2], %s1420_s2 }
  0x6b   : > { %2049 = dma.done.wait (%p2449_p4), %s331_s19, 2048  }
  0x6c   : > { %2051 = vsyncadd (%p2449_p4), %s331_s19, 4294965248  ;;  %p2450_p6 = scmp.eq.s32.totalorder %s2158_s9, 0 }
  0x6e   : > { %2053 = dma.done.wait (%p2450_p6), [#allocation6], 3072   ;;  %p2451_p8 = pmov %p2450_p6 }
  0x6f   : > { %p2452_p9 = pmov %p2450_p6 }
  0x70   : > { %2055 = vsyncadd (%p2451_p8), [#allocation6], 4294964224 }
  0x71   : > { %2057 = dma.done.wait (%p2452_p9), [#allocation9], 2048   ;;  %p2453_p2 = pmov %p2450_p6 }
  0x72   : > { %v1810_v0 = vld [vmem:[#allocation5 + $0x78] sm:$0xff]   ;;  %v1812_v2 = vld [vmem:[#allocation5 + $0x70] sm:$0xff]   ;;  %v1814_v4 = vld [vmem:[#allocation5 + $0x68] sm:$0xff]   ;;  %s2357_s24 = scalar_lea.vmem [#allocation11], %s1420_s2  ;;  %s1492_s17 = sshll.u32 %s2158_s9, 11 }
  0x73   : > { %2059 = vsyncadd (%p2453_p2), [#allocation9], 4294965248  ;;  %v1811_v1 = vld [vmem:[#allocation5 + $0x38] sm:$0xff]   ;;  %1493 = vmatprep.subr.bf16.mxu0 %v1810_v0  ;;  %v1813_v3 = vld [vmem:[#allocation5 + $0x30] sm:$0xff]   ;;  %s1297_s22 = sshll.u32 %s2357_s24, 4  ;;  %s2378_s2 = scalar_lea.hbm %s2433_s8, %s1492_s17  ;;  %s2380_s22 = int_to_ptr.vmem [resolvable:$true] %s1297_s22 }
  0x74   : > { %1494 = vmatpush3.bf16.msra.mxu0 %v1811_v1  ;;  %v1815_v5 = vld [vmem:[#allocation5 + $0x28] sm:$0xff]   ;;  %v1816_v6 = vld [vmem:[#allocation5 + $0x60] sm:$0xff]   ;;  %v1818_v8 = vld [vmem:[#allocation5 + $0x58] sm:$0xff]   ;;  %s1284_s19 = scalar_lea.sflag [#allocation4], %s2292_s1  ;;  %s2006_s9 = scalar_lea.vmem %s2380_s22, 2048 }
  0x75   : > { %1495 = vmatprep.subr.bf16.mxu0 %v1812_v2  ;;  %v1817_v7 = vld [vmem:[#allocation5 + $0x20] sm:$0xff]   ;;  %v1819_v9 = vld [vmem:[#allocation5 + $0x18] sm:$0xff]   ;;  %v1820_v10 = vld [vmem:[#allocation5 + $0x50] sm:$0xff]   ;;  %p2007_p10 = scmp.ne.s32.totalorder %s2380_s22, %s2006_s9  ;;  %p2454_p12 = scmp.ne.s32.totalorder %s2446_s14, 0 }
  0x76   : > { %v1828_v11 = vld [vmem:[%s2298_s18 + $0x4] ss:$8 sps:$4 sm:$0xff]   ;;  %v1821_v12 = vld [vmem:[#allocation5 + $0x10] sm:$0xff]   ;;  %v1850_v17 = vld [vmem:[#allocation7 + $0x38] sm:$0xff]  }
  0x77   : > { %642 = vmatprep.mubr.bf16.mxu0 %v1828_v11  ;;  %v1822_v13 = vld [vmem:[#allocation5 + $0x48] sm:$0xff]   ;;  %v1824_v15 = vld [vmem:[#allocation5 + $0x40] sm:$0xff]   ;;  %v1851_v19 = vld [vmem:[#allocation7 + $0x30] sm:$0xff]   ;;  %1605 = vmatprep.subr.bf16.mxu1 %v1850_v17  ;;  %p2008_p7 = pnand %p2007_p10, %p2454_p12 }
  0x78   : > { %1496 = vmatpush3.bf16.msra.mxu0 %v1813_v3  ;;  %v1823_v14 = vld [vmem:[#allocation5 + $0x8] sm:$0xff]   ;;  %v1825_v16 = vld [vmem:[#allocation5] sm:$0xff]   ;;  %v1829_v20 = vld [vmem:[%s2298_s18 + $0x14] ss:$8 sps:$4 sm:$0xff]   ;;  %1606 = vmatpush3.bf16.msra.mxu1 %v1850_v17 }
  0x79   : > { %1497 = vmatprep.subr.bf16.mxu0 %v1814_v4  ;;  %v1826_v18 = vld [vmem:[%s2298_s18] ss:$8 sps:$4 sm:$0xff]   ;;  %1607 = vmatprep.subr.bf16.mxu1 %v1851_v19  ;;  %v1831_v23 = vld [vmem:[%s2298_s18 + $0x10] ss:$8 sps:$4 sm:$0xff]   ;;  %v1832_v24 = vld [vmem:[%s2298_s18 + $0x24] ss:$8 sps:$4 sm:$0xff]   ;;  %p2009_p1 = pneg %p2008_p7 }
  0x7a   : > { %v1852_v21 = vld [vmem:[#allocation7 + $0x28] sm:$0xff]   ;;  %v1853_v22 = vld [vmem:[#allocation7 + $0x20] sm:$0xff]   ;;  %v1835_v26 = vld [vmem:[%s2298_s18 + $0x34] ss:$8 sps:$4 sm:$0xff]  }
  0x7b   : > { %v1834_v25 = vld [vmem:[%s2298_s18 + $0x20] ss:$8 sps:$4 sm:$0xff]   ;;  %v1837_v27 = vld [vmem:[%s2298_s18 + $0x30] ss:$8 sps:$4 sm:$0xff]   ;;  %v1838_v28 = vld [vmem:[%s2298_s18 + $0x44] ss:$8 sps:$4 sm:$0xff]  }
  0x7c   : > { %1498 = vmatpush3.bf16.msra.mxu0 %v1815_v5  ;;  %1608 = vmatpush3.bf16.msra.mxu1 %v1851_v19  ;;  %v1840_v29 = vld [vmem:[%s2298_s18 + $0x40] ss:$8 sps:$4 sm:$0xff]   ;;  %v1841_v30 = vld [vmem:[%s2298_s18 + $0x54] ss:$8 sps:$4 sm:$0xff]   ;;  %v1843_v31 = vld [vmem:[%s2298_s18 + $0x50] ss:$8 sps:$4 sm:$0xff]  }
  0x7d   : > { %1499 = vmatprep.subr.bf16.mxu0 %v1816_v6  ;;  %1609 = vmatprep.subr.bf16.mxu1 %v1852_v21  ;;  %v1844_v32 = vld [vmem:[%s2298_s18 + $0x64] ss:$8 sps:$4 sm:$0xff]   ;;  %v1846_v33 = vld [vmem:[%s2298_s18 + $0x60] ss:$8 sps:$4 sm:$0xff]   ;;  %v1847_v34 = vld [vmem:[%s2298_s18 + $0x74] ss:$8 sps:$4 sm:$0xff]  }
  0x7e   : > { %v1849_v35 = vld [vmem:[%s2298_s18 + $0x70] ss:$8 sps:$4 sm:$0xff]   ;;  %v1856_v38 = vld [vmem:[#allocation7 + $0x8] sm:$0xff]   ;;  %v1857_v39 = vld [vmem:[#allocation7] sm:$0xff]   ;;  %s2089_s18 = smov [#allocation11]  }
  0x7f   : > { %v1854_v36 = vld [vmem:[#allocation7 + $0x18] sm:$0xff]   ;;  %v1855_v37 = vld [vmem:[#allocation7 + $0x10] sm:$0xff]   ;;  %v1860_v59 = vld [vmem:[#allocation8 + $0x28] sm:$0xff]   ;;  %s2010_s11 = sshll.u32 %s2089_s18, 4  ;;  %s2011_s11 = int_to_ptr.vmem [resolvable:$false] %s2010_s11 }
  0x80   : > { %1500 = vmatpush3.bf16.msra.mxu0 %v1817_v7  ;;  %1610 = vmatpush3.bf16.msra.mxu1 %v1852_v21  ;;  %v1858_v40 = vld [vmem:[#allocation8 + $0x38] sm:$0xff]   ;;  %v1859_v56 = vld [vmem:[#allocation8 + $0x30] sm:$0xff]   ;;  %v1861_v1 = vld [vmem:[#allocation8 + $0x20] sm:$0xff]   ;;  %s2012_s13 = scalar_lea.vmem %s2011_s11, 4096  ;;  %p2013_p13 = scmp.lt.s32.totalorder %s2380_s22, %s2011_s11 }
  0x81   : > { %1501 = vmatprep.subr.bf16.mxu0 %v1818_v8  ;;  %1611 = vmatprep.subr.bf16.mxu1 %v1853_v22  ;;  %v1862_v4 = vld [vmem:[#allocation8 + $0x18] sm:$0xff]   ;;  %p2014_p0 = scmp.lt.s32.totalorder %s2012_s13, %s2006_s9 }
  0x83   : > { %p2015_p11 = por %p2014_p0, %p2013_p13 }
  0x84   : > { %1502 = vmatpush3.bf16.msra.mxu0 %v1819_v9  ;;  %1612 = vmatpush3.bf16.msra.mxu1 %v1853_v22 }
  0x85   : > { %1503 = vmatprep.subr.bf16.mxu0 %v1820_v10  ;;  %1613 = vmatprep.subr.bf16.mxu1 %v1854_v36  ;;  %p2016_p5 = pnand %p2015_p11, %p2009_p1 }
  0x88   : > { %1504 = vmatpush3.bf16.msra.mxu0 %v1821_v12  ;;  %1614 = vmatpush3.bf16.msra.mxu1 %v1854_v36 }
  0x89   : > { %1505 = vmatprep.subr.bf16.mxu0 %v1822_v13  ;;  %1615 = vmatprep.subr.bf16.mxu1 %v1855_v37 }
  0x8c   : > { %1506 = vmatpush3.bf16.msra.mxu0 %v1823_v14  ;;  %1616 = vmatpush3.bf16.msra.mxu1 %v1855_v37  ;;  %v1863_v37 = vld [vmem:[#allocation8 + $0x10] sm:$0xff]  }
  0x8d   : > { %1507 = vmatprep.subr.bf16.mxu0 %v1824_v15  ;;  %1617 = vmatprep.subr.bf16.mxu1 %v1856_v38 }
  0x90   : > { %1508 = vmatpush3.bf16.msra.mxu0 %v1825_v16  ;;  %1618 = vmatpush3.bf16.msra.mxu1 %v1856_v38  ;;  %v1864_v38 = vld [vmem:[#allocation8 + $0x8] sm:$0xff]  }
  0x91   : > { %1619 = vmatprep.subr.bf16.mxu1 %v1857_v39 }
  0x93   : > { %643 = vmatmul.mubr.bf16.vlgmr.msra.gmra.mxu0 %v1826_v18 }
  0x94   : > { %650 = vmatprep.mubr.bf16.mxu0 %v1829_v20  ;;  %1620 = vmatpush3.bf16.msra.mxu1 %v1857_v39  ;;  %v1865_v39 = vld [vmem:[#allocation8] sm:$0xff]  }
  0x95   : > { %1637 = vmatprep.subr.bf16.mxu1 %v1858_v40 }
  0x9b   : > { %651 = vmatmul.mubr.bf16.gmra.mxu0 %v1831_v23 }
  0x9c   : > { %658 = vmatprep.mubr.bf16.mxu0 %v1832_v24 }
  0xa3   : > { %659 = vmatmul.mubr.bf16.gmra.mxu0 %v1834_v25 }
  0xa4   : > { %666 = vmatprep.mubr.bf16.mxu0 %v1835_v26 }
  0xab   : > { %667 = vmatmul.mubr.bf16.gmra.mxu0 %v1837_v27 }
  0xac   : > { %674 = vmatprep.mubr.bf16.mxu0 %v1838_v28 }
  0xb3   : > { %675 = vmatmul.mubr.bf16.gmra.mxu0 %v1840_v29 }
  0xb4   : > { %682 = vmatprep.mubr.bf16.mxu0 %v1841_v30 }
  0xbb   : > { %683 = vmatmul.mubr.bf16.gmra.mxu0 %v1843_v31 }
  0xbc   : > { %690 = vmatprep.mubr.bf16.mxu0 %v1844_v32 }
  0xc3   : > { %691 = vmatmul.mubr.bf16.gmra.mxu0 %v1846_v33 }
  0xc4   : > { %698 = vmatprep.mubr.bf16.mxu0 %v1847_v34 }
  0xcb   : > { %699 = vmatmul.mubr.bf16.gmra.mxu0 %v1849_v35 }
 0x153   : > { %v1509_v41 = vpop.f32.mrf.mxu0 }
 0x155   : > { %v1510_v42 = vpop.f32.mrf.mxu0 }
 0x156   : > { %v1511_v45 = vadd.f32 %v1510_v42, %v1509_v41  ;;  %v1867_v41 = vld [vmem:[#allocation10 + $0x30] sm:$0xff]   ;;  %v1868_v42 = vld [vmem:[#allocation10 + $0x28] sm:$0xff]  }
 0x157   : > { %v1512_v43 = vpop.f32.mrf.mxu0 }
 0x159   : > { %v1513_v44 = vpop.f32.mrf.mxu0 }
 0x15a   : > { %v1514_v46 = vadd.f32 %v1513_v44, %v1512_v43  ;;  %v1869_v43 = vld [vmem:[#allocation10 + $0x20] sm:$0xff]   ;;  %v1870_v44 = vld [vmem:[#allocation10 + $0x18] sm:$0xff]  }
 0x15b   : > { %v1515_v47 = vpop.f32.mrf.mxu0 }
 0x15c   : > { %v707_v48 = vpack.c.bf16 %v1514_v46, %v1511_v45 }
 0x15d   : > { %v1516_v49 = vpop.f32.mrf.mxu0 }
 0x15e   : > { %1621 = vmatprep.mubr.bf16.mxu1 %v707_v48  ;;  %v1517_v52 = vadd.f32 %v1516_v49, %v1515_v47  ;;  %v2331_v47 = vld [vmem:[%s2428_s3] ss:$0 sm:$0xff] }
 0x15f   : > { %v1518_v50 = vpop.f32.mrf.mxu0 }
 0x161   : > { %v1519_v51 = vpop.f32.mrf.mxu0 }
 0x162   : > { %v1520_v53 = vadd.f32 %v1519_v51, %v1518_v50 }
 0x163   : > { %v1521_v54 = vpop.f32.mrf.mxu0 }
 0x164   : > { %v708_v55 = vpack.c.bf16 %v1520_v53, %v1517_v52 }
 0x165   : > { %v1522_v57 = vpop.f32.mrf.mxu0 }
 0x166   : > { %1622 = vmatmul.mubr.bf16.vlgmr.msra.gmra.mxu1 %v708_v55  ;;  %v1523_v61 = vadd.f32 %v1522_v57, %v1521_v54 }
 0x167   : > { %v1524_v58 = vpop.f32.mrf.mxu0  ;;  %1638 = vmatpush3.bf16.msra.mxu1 %v1858_v40  ;;  %v1866_v40 = vld [vmem:[#allocation10 + $0x38] sm:$0xff]  }
 0x168   : > { %1639 = vmatprep.subr.bf16.mxu1 %v1859_v56  ;;  %1669 = vmatprep.subr.bf16.mxu0 %v1866_v40 }
 0x169   : > { %v1525_v60 = vpop.f32.mrf.mxu0  ;;  %1670 = vmatpush3.bf16.msra.mxu0 %v1866_v40 }
 0x16a   : > { %v1526_v62 = vadd.f32 %v1525_v60, %v1524_v58  ;;  %1671 = vmatprep.subr.bf16.mxu0 %v1867_v41 }
 0x16b   : > { %v1527_v63 = vpop.f32.mrf.mxu0  ;;  %1640 = vmatpush3.bf16.msra.mxu1 %v1859_v56 }
 0x16c   : > { %v709_v0 = vpack.c.bf16 %v1526_v62, %v1523_v61  ;;  %1641 = vmatprep.subr.bf16.mxu1 %v1860_v59 }
 0x16d   : > { %v1528_v2 = vpop.f32.mrf.mxu0  ;;  %1672 = vmatpush3.bf16.msra.mxu0 %v1867_v41 }
 0x16e   : > { %1625 = vmatprep.mubr.bf16.mxu1 %v709_v0  ;;  %v1529_v6 = vadd.f32 %v1528_v2, %v1527_v63  ;;  %1673 = vmatprep.subr.bf16.mxu0 %v1868_v42 }
 0x16f   : > { %v1530_v3 = vpop.f32.mrf.mxu0  ;;  %1642 = vmatpush3.bf16.msra.mxu1 %v1860_v59 }
 0x170   : > { %1643 = vmatprep.subr.bf16.mxu1 %v1861_v1 }
 0x171   : > { %v1531_v5 = vpop.f32.mrf.mxu0  ;;  %1674 = vmatpush3.bf16.msra.mxu0 %v1868_v42 }
 0x172   : > { %v1532_v7 = vadd.f32 %v1531_v5, %v1530_v3  ;;  %1675 = vmatprep.subr.bf16.mxu0 %v1869_v43 }
 0x173   : > { %v1533_v8 = vpop.f32.mrf.mxu0  ;;  %1644 = vmatpush3.bf16.msra.mxu1 %v1861_v1 }
 0x174   : > { %v710_v9 = vpack.c.bf16 %v1532_v7, %v1529_v6  ;;  %1645 = vmatprep.subr.bf16.mxu1 %v1862_v4 }
 0x175   : > { %v1534_v10 = vpop.f32.mrf.mxu0  ;;  %1676 = vmatpush3.bf16.msra.mxu0 %v1869_v43 }
 0x176   : > { %1626 = vmatmul.mubr.bf16.gmra.mxu1 %v710_v9  ;;  %v1535_v13 = vadd.f32 %v1534_v10, %v1533_v8  ;;  %1677 = vmatprep.subr.bf16.mxu0 %v1870_v44 }
 0x177   : > { %v1536_v11 = vpop.f32.mrf.mxu0  ;;  %1646 = vmatpush3.bf16.msra.mxu1 %v1862_v4 }
 0x178   : > { %1647 = vmatprep.subr.bf16.mxu1 %v1863_v37 }
 0x179   : > { %v1537_v12 = vpop.f32.mrf.mxu0  ;;  %1678 = vmatpush3.bf16.msra.mxu0 %v1870_v44 }
 0x17a   : > { %v1538_v14 = vadd.f32 %v1537_v12, %v1536_v11 }
 0x17b   : > { %v1539_v15 = vpop.f32.mrf.mxu0  ;;  %1648 = vmatpush3.bf16.msra.mxu1 %v1863_v37 }
 0x17c   : > { %v711_v16 = vpack.c.bf16 %v1538_v14, %v1535_v13  ;;  %1649 = vmatprep.subr.bf16.mxu1 %v1864_v38 }
 0x17d   : > { %v1540_v17 = vpop.f32.mrf.mxu0 }
 0x17e   : > { %1629 = vmatprep.mubr.bf16.mxu1 %v711_v16  ;;  %v1541_v20 = vadd.f32 %v1540_v17, %v1539_v15 }
 0x17f   : > { %v1542_v18 = vpop.f32.mrf.mxu0  ;;  %1650 = vmatpush3.bf16.msra.mxu1 %v1864_v38  ;;  %v1871_v38 = vld [vmem:[#allocation10 + $0x10] sm:$0xff]  }
 0x180   : > { %1651 = vmatprep.subr.bf16.mxu1 %v1865_v39  ;;  %1679 = vmatprep.subr.bf16.mxu0 %v1871_v38 }
 0x181   : > { %v1543_v19 = vpop.f32.mrf.mxu0  ;;  %1680 = vmatpush3.bf16.msra.mxu0 %v1871_v38 }
 0x182   : > { %v1544_v21 = vadd.f32 %v1543_v19, %v1542_v18 }
 0x183   : > { %v1545_v22 = vpop.f32.mrf.mxu0  ;;  %1652 = vmatpush3.bf16.msra.mxu1 %v1865_v39  ;;  %v1872_v39 = vld [vmem:[#allocation10 + $0x8] sm:$0xff]  }
 0x184   : > { %v712_v23 = vpack.c.bf16 %v1544_v21, %v1541_v20  ;;  %1701 = vmatprep.subr.bf16.mxu1 %v1866_v40  ;;  %1681 = vmatprep.subr.bf16.mxu0 %v1872_v39 }
 0x185   : > { %v1546_v24 = vpop.f32.mrf.mxu0  ;;  %1682 = vmatpush3.bf16.msra.mxu0 %v1872_v39 }
 0x186   : > { %1630 = vmatmul.mubr.bf16.gmra.mxu1 %v712_v23  ;;  %v1547_v27 = vadd.f32 %v1546_v24, %v1545_v22 }
 0x187   : > { %v1548_v25 = vpop.f32.mrf.mxu0 }
 0x189   : > { %v1549_v26 = vpop.f32.mrf.mxu0 }
 0x18a   : > { %v1550_v28 = vadd.f32 %v1549_v26, %v1548_v25 }
 0x18b   : > { %v1551_v29 = vpop.f32.mrf.mxu0 }
 0x18c   : > { %v713_v30 = vpack.c.bf16 %v1550_v28, %v1547_v27 }
 0x18d   : > { %v1552_v31 = vpop.f32.mrf.mxu0 }
 0x18e   : > { %1633 = vmatprep.mubr.bf16.mxu1 %v713_v30  ;;  %v1553_v34 = vadd.f32 %v1552_v31, %v1551_v29 }
 0x18f   : > { %v1554_v32 = vpop.f32.mrf.mxu0 }
 0x191   : > { %v1555_v33 = vpop.f32.mrf.mxu0 }
 0x192   : > { %v1556_v35 = vadd.f32 %v1555_v33, %v1554_v32 }
 0x194   : > { %v714_v36 = vpack.c.bf16 %v1556_v35, %v1553_v34 }
 0x196   : > { %1634 = vmatmul.mubr.bf16.gmra.mxu1 %v714_v36 }
 0x226   : > { %v1623_v45 = vpop.f32.mrf.mxu1 }
 0x227   : > { %v829_v51 = vadd.f32 %v1623_v45, %v2331_v47 }
 0x228   : > { %v820_v46 = vpop.f32.mrf.mxu1 }
 0x229   : > { %v821_v49 = vadd.f32 %v2331_v47, %v820_v46  ;;  %v885_v57 = vmax.f32 %v829_v51, 0.0 }
 0x22a   : > { %v1624_v48 = vpop.f32.mrf.mxu1 }
 0x22b   : > { %v832_v50 = vadd.f32 %v1624_v48, %v2331_v47  ;;  %v883_v55 = vmax.f32 %v821_v49, 0.0 }
 0x22c   : > { %v823_v52 = vpop.f32.mrf.mxu1 }
 0x22d   : > { %v824_v53 = vadd.f32 %v2331_v47, %v823_v52  ;;  %v886_v54 = vmax.f32 %v832_v50, 0.0 }
 0x22f   : > { %v884_v56 = vmax.f32 %v824_v53, 0.0  ;;  %v900_v59 = vpack.c.bf16 %v886_v54, %v885_v57 }
 0x231   : > { %v899_v58 = vpack.c.bf16 %v884_v56, %v883_v55 }
 0x233   : > { %1653 = vmatprep.mubr.bf16.mxu1 %v899_v58 }
 0x234   : > { %1654 = vmatmul.mubr.bf16.vlgmr.msra.gmra.mxu1 %v900_v59 }
 0x235   : > { %1709 = vmatpush3.bf16.msra.mxu1 %v1866_v40  ;;  %v1873_v40 = vld [vmem:[#allocation10] sm:$0xff]  }
 0x236   : > { %v1627_v60 = vpop.f32.mrf.mxu1  ;;  %1702 = vmatprep.subr.bf16.mxu1 %v1867_v41  ;;  %1683 = vmatprep.subr.bf16.mxu0 %v1873_v40 }
 0x237   : > { %v845_v1 = vadd.f32 %v1627_v60, %v2331_v47  ;;  %1684 = vmatpush3.bf16.msra.mxu0 %v1873_v40 }
 0x238   : > { %v836_v61 = vpop.f32.mrf.mxu1 }
 0x239   : > { %1710 = vmatpush3.bf16.msra.mxu1 %v1867_v41  ;;  %v837_v63 = vadd.f32 %v2331_v47, %v836_v61  ;;  %v889_v7 = vmax.f32 %v845_v1, 0.0 }
 0x23a   : > { %v1628_v62 = vpop.f32.mrf.mxu1  ;;  %1703 = vmatprep.subr.bf16.mxu1 %v1868_v42 }
 0x23b   : > { %v848_v0 = vadd.f32 %v1628_v62, %v2331_v47  ;;  %v887_v5 = vmax.f32 %v837_v63, 0.0 }
 0x23c   : > { %v839_v2 = vpop.f32.mrf.mxu1 }
 0x23d   : > { %v840_v3 = vadd.f32 %v2331_v47, %v839_v2  ;;  %1711 = vmatpush3.bf16.msra.mxu1 %v1868_v42  ;;  %v890_v4 = vmax.f32 %v848_v0, 0.0 }
 0x23e   : > { %1704 = vmatprep.subr.bf16.mxu1 %v1869_v43 }
 0x23f   : > { %v888_v6 = vmax.f32 %v840_v3, 0.0  ;;  %v902_v9 = vpack.c.bf16 %v890_v4, %v889_v7 }
 0x241   : > { %v901_v8 = vpack.c.bf16 %v888_v6, %v887_v5  ;;  %1712 = vmatpush3.bf16.msra.mxu1 %v1869_v43  ;;  %v1467_v43 = vld [vmem:[%s2430_s5] ss:$0 sm:$0xff] }
 0x242   : > { %1705 = vmatprep.subr.bf16.mxu1 %v1870_v44 }
 0x243   : > { %1657 = vmatprep.mubr.bf16.mxu1 %v901_v8 }
 0x244   : > { %1658 = vmatmul.mubr.bf16.gmra.mxu1 %v902_v9 }
 0x245   : > { %1713 = vmatpush3.bf16.msra.mxu1 %v1870_v44 }
 0x246   : > { %v1631_v10 = vpop.f32.mrf.mxu1  ;;  %1706 = vmatprep.subr.bf16.mxu1 %v1871_v38 }
 0x247   : > { %v861_v15 = vadd.f32 %v1631_v10, %v2331_v47 }
 0x248   : > { %v852_v11 = vpop.f32.mrf.mxu1 }
 0x249   : > { %v853_v13 = vadd.f32 %v2331_v47, %v852_v11  ;;  %v893_v21 = vmax.f32 %v861_v15, 0.0  ;;  %1714 = vmatpush3.bf16.msra.mxu1 %v1871_v38 }
 0x24a   : > { %v1632_v12 = vpop.f32.mrf.mxu1  ;;  %1707 = vmatprep.subr.bf16.mxu1 %v1872_v39 }
 0x24b   : > { %v864_v14 = vadd.f32 %v1632_v12, %v2331_v47  ;;  %v891_v19 = vmax.f32 %v853_v13, 0.0 }
 0x24c   : > { %v855_v16 = vpop.f32.mrf.mxu1 }
 0x24d   : > { %v856_v17 = vadd.f32 %v2331_v47, %v855_v16  ;;  %v894_v18 = vmax.f32 %v864_v14, 0.0  ;;  %1715 = vmatpush3.bf16.msra.mxu1 %v1872_v39 }
 0x24e   : > { %1708 = vmatprep.subr.bf16.mxu1 %v1873_v40 }
 0x24f   : > { %v892_v20 = vmax.f32 %v856_v17, 0.0  ;;  %v904_v23 = vpack.c.bf16 %v894_v18, %v893_v21 }
 0x251   : > { %v903_v22 = vpack.c.bf16 %v892_v20, %v891_v19  ;;  %1716 = vmatpush3.bf16.msra.mxu1 %v1873_v40 }
 0x253   : > { %1661 = vmatprep.mubr.bf16.mxu1 %v903_v22 }
 0x254   : > { %1662 = vmatmul.mubr.bf16.gmra.mxu1 %v904_v23 }
 0x256   : > { %v1635_v24 = vpop.f32.mrf.mxu1 }
 0x257   : > { %v877_v29 = vadd.f32 %v1635_v24, %v2331_v47 }
 0x258   : > { %v868_v25 = vpop.f32.mrf.mxu1 }
 0x259   : > { %v869_v27 = vadd.f32 %v2331_v47, %v868_v25  ;;  %v897_v35 = vmax.f32 %v877_v29, 0.0 }
 0x25a   : > { %v1636_v26 = vpop.f32.mrf.mxu1 }
 0x25b   : > { %v880_v28 = vadd.f32 %v1636_v26, %v2331_v47  ;;  %v895_v33 = vmax.f32 %v869_v27, 0.0 }
 0x25c   : > { %v871_v30 = vpop.f32.mrf.mxu1 }
 0x25d   : > { %v872_v31 = vadd.f32 %v2331_v47, %v871_v30  ;;  %v898_v32 = vmax.f32 %v880_v28, 0.0 }
 0x25f   : > { %v896_v34 = vmax.f32 %v872_v31, 0.0  ;;  %v906_v37 = vpack.c.bf16 %v898_v32, %v897_v35 }
 0x261   : > { %v905_v36 = vpack.c.bf16 %v896_v34, %v895_v33  ;;  %v1476_v34 = vld [vmem:[%s2432_s7] ss:$0 sm:$0xff] }
 0x263   : > { %1665 = vmatprep.mubr.bf16.mxu1 %v905_v36 }
 0x264   : > { %1666 = vmatmul.mubr.bf16.gmra.mxu1 %v906_v37 }
 0x2f4   : > { %v1655_v41 = vpop.f32.mrf.mxu1 }
 0x2f5   : > { %v1021_v47 = vadd.f32 %v1655_v41, %v1467_v43 }
 0x2f6   : > { %v1012_v42 = vpop.f32.mrf.mxu1 }
 0x2f7   : > { %v1013_v45 = vadd.f32 %v1467_v43, %v1012_v42  ;;  %v1077_v53 = vmax.f32 %v1021_v47, 0.0 }
 0x2f8   : > { %v1656_v44 = vpop.f32.mrf.mxu1 }
 0x2f9   : > { %v1024_v46 = vadd.f32 %v1656_v44, %v1467_v43  ;;  %v1075_v51 = vmax.f32 %v1013_v45, 0.0 }
 0x2fa   : > { %v1015_v48 = vpop.f32.mrf.mxu1 }
 0x2fb   : > { %v1016_v49 = vadd.f32 %v1467_v43, %v1015_v48  ;;  %v1078_v50 = vmax.f32 %v1024_v46, 0.0 }
 0x2fd   : > { %v1076_v52 = vmax.f32 %v1016_v49, 0.0  ;;  %v1092_v55 = vpack.c.bf16 %v1078_v50, %v1077_v53 }
 0x2ff   : > { %v1091_v54 = vpack.c.bf16 %v1076_v52, %v1075_v51 }
 0x301   : > { %1685 = vmatprep.mubr.bf16.mxu0 %v1091_v54 }
 0x302   : > { %1686 = vmatmul.mubr.bf16.vlgmr.msra.gmra.mxu0 %v1092_v55 }
 0x304   : > { %v1659_v56 = vpop.f32.mrf.mxu1 }
 0x305   : > { %v1037_v61 = vadd.f32 %v1659_v56, %v1467_v43 }
 0x306   : > { %v1028_v57 = vpop.f32.mrf.mxu1 }
 0x307   : > { %v1029_v59 = vadd.f32 %v1467_v43, %v1028_v57  ;;  %v1081_v3 = vmax.f32 %v1037_v61, 0.0 }
 0x308   : > { %v1660_v58 = vpop.f32.mrf.mxu1 }
 0x309   : > { %v1040_v60 = vadd.f32 %v1660_v58, %v1467_v43  ;;  %v1079_v1 = vmax.f32 %v1029_v59, 0.0 }
 0x30a   : > { %v1031_v62 = vpop.f32.mrf.mxu1 }
 0x30b   : > { %v1032_v63 = vadd.f32 %v1467_v43, %v1031_v62  ;;  %v1082_v0 = vmax.f32 %v1040_v60, 0.0 }
 0x30d   : > { %v1080_v2 = vmax.f32 %v1032_v63, 0.0  ;;  %v1094_v5 = vpack.c.bf16 %v1082_v0, %v1081_v3 }
 0x30f   : > { %v1093_v4 = vpack.c.bf16 %v1080_v2, %v1079_v1 }
 0x311   : > { %1689 = vmatprep.mubr.bf16.mxu0 %v1093_v4 }
 0x312   : > { %1690 = vmatmul.mubr.bf16.gmra.mxu0 %v1094_v5 }
 0x314   : > { %v1663_v6 = vpop.f32.mrf.mxu1 }
 0x315   : > { %v1053_v11 = vadd.f32 %v1663_v6, %v1467_v43 }
 0x316   : > { %v1044_v7 = vpop.f32.mrf.mxu1 }
 0x317   : > { %v1045_v9 = vadd.f32 %v1467_v43, %v1044_v7  ;;  %v1085_v17 = vmax.f32 %v1053_v11, 0.0 }
 0x318   : > { %v1664_v8 = vpop.f32.mrf.mxu1 }
 0x319   : > { %v1056_v10 = vadd.f32 %v1664_v8, %v1467_v43  ;;  %v1083_v15 = vmax.f32 %v1045_v9, 0.0 }
 0x31a   : > { %v1047_v12 = vpop.f32.mrf.mxu1 }
 0x31b   : > { %v1048_v13 = vadd.f32 %v1467_v43, %v1047_v12  ;;  %v1086_v14 = vmax.f32 %v1056_v10, 0.0 }
 0x31d   : > { %v1084_v16 = vmax.f32 %v1048_v13, 0.0  ;;  %v1096_v19 = vpack.c.bf16 %v1086_v14, %v1085_v17 }
 0x31f   : > { %v1095_v18 = vpack.c.bf16 %v1084_v16, %v1083_v15 }
 0x321   : > { %1693 = vmatprep.mubr.bf16.mxu1 %v1095_v18 }
 0x322   : > { %1694 = vmatmul.mubr.bf16.vlgmr.msra.gmra.mxu1 %v1096_v19 }
 0x324   : > { %v1667_v20 = vpop.f32.mrf.mxu1 }
 0x325   : > { %v1069_v25 = vadd.f32 %v1667_v20, %v1467_v43 }
 0x326   : > { %v1060_v21 = vpop.f32.mrf.mxu1 }
 0x327   : > { %v1061_v23 = vadd.f32 %v1467_v43, %v1060_v21  ;;  %v1089_v31 = vmax.f32 %v1069_v25, 0.0 }
 0x328   : > { %v1668_v22 = vpop.f32.mrf.mxu1 }
 0x329   : > { %v1072_v24 = vadd.f32 %v1668_v22, %v1467_v43  ;;  %v1087_v29 = vmax.f32 %v1061_v23, 0.0 }
 0x32a   : > { %v1063_v26 = vpop.f32.mrf.mxu1 }
 0x32b   : > { %v1064_v27 = vadd.f32 %v1467_v43, %v1063_v26  ;;  %v1090_v28 = vmax.f32 %v1072_v24, 0.0 }
 0x32d   : > { %v1088_v30 = vmax.f32 %v1064_v27, 0.0  ;;  %v1098_v33 = vpack.c.bf16 %v1090_v28, %v1089_v31 }
 0x32f   : > { %v1097_v32 = vpack.c.bf16 %v1088_v30, %v1087_v29 }
 0x331   : > { %1697 = vmatprep.mubr.bf16.mxu1 %v1097_v32 }
 0x332   : > { %1698 = vmatmul.mubr.bf16.gmra.mxu1 %v1098_v33 }
 0x3c2   : > { %v1687_v35 = vpop.f32.mrf.mxu0 }
 0x3c3   : > { %v1213_v36 = vadd.f32 %v1687_v35, %v1476_v34 }
 0x3c4   : > { %v1204_v37 = vpop.f32.mrf.mxu0 }
 0x3c5   : > { %1269 = vst [vmem:[%s2357_s24 + $0x10] sm:$0xff] %v1213_v36  ;;  %v1205_v38 = vadd.f32 %v1476_v34, %v1204_v37 }
 0x3c6   : > { %v1688_v39 = vpop.f32.mrf.mxu0 }
 0x3c7   : > { %1267 = vst [vmem:[%s2357_s24] sm:$0xff] %v1205_v38  ;;  %v1216_v40 = vadd.f32 %v1688_v39, %v1476_v34 }
 0x3c8   : > { %v1207_v41 = vpop.f32.mrf.mxu0 }
 0x3c9   : > { %1270 = vst [vmem:[%s2357_s24 + $0x18] sm:$0xff] %v1216_v40  ;;  %v1208_v42 = vadd.f32 %v1476_v34, %v1207_v41 }
 0x3cb   : > { %1268 = vst [vmem:[%s2357_s24 + $0x8] sm:$0xff] %v1208_v42 }
 0x3d2   : > { %v1691_v43 = vpop.f32.mrf.mxu0 }
 0x3d3   : > { %v1229_v44 = vadd.f32 %v1691_v43, %v1476_v34 }
 0x3d4   : > { %v1220_v45 = vpop.f32.mrf.mxu0 }
 0x3d5   : > { %1273 = vst [vmem:[%s2357_s24 + $0x30] sm:$0xff] %v1229_v44  ;;  %v1221_v46 = vadd.f32 %v1476_v34, %v1220_v45 }
 0x3d6   : > { %v1692_v47 = vpop.f32.mrf.mxu0 }
 0x3d7   : > { %1271 = vst [vmem:[%s2357_s24 + $0x20] sm:$0xff] %v1221_v46  ;;  %v1232_v48 = vadd.f32 %v1692_v47, %v1476_v34 }
 0x3d8   : > { %v1223_v49 = vpop.f32.mrf.mxu0 }
 0x3d9   : > { %1274 = vst [vmem:[%s2357_s24 + $0x38] sm:$0xff] %v1232_v48  ;;  %v1224_v50 = vadd.f32 %v1476_v34, %v1223_v49 }
 0x3db   : > { %1272 = vst [vmem:[%s2357_s24 + $0x28] sm:$0xff] %v1224_v50 }
 0x3e2   : > { %v1695_v51 = vpop.f32.mrf.mxu1 }
 0x3e3   : > { %v1245_v52 = vadd.f32 %v1695_v51, %v1476_v34 }
 0x3e4   : > { %v1236_v53 = vpop.f32.mrf.mxu1 }
 0x3e5   : > { %1277 = vst [vmem:[%s2357_s24 + $0x50] sm:$0xff] %v1245_v52  ;;  %v1237_v54 = vadd.f32 %v1476_v34, %v1236_v53 }
 0x3e6   : > { %v1696_v55 = vpop.f32.mrf.mxu1 }
 0x3e7   : > { %1275 = vst [vmem:[%s2357_s24 + $0x40] sm:$0xff] %v1237_v54  ;;  %v1248_v56 = vadd.f32 %v1696_v55, %v1476_v34 }
 0x3e8   : > { %v1239_v57 = vpop.f32.mrf.mxu1 }
 0x3e9   : > { %1278 = vst [vmem:[%s2357_s24 + $0x58] sm:$0xff] %v1248_v56  ;;  %v1240_v58 = vadd.f32 %v1476_v34, %v1239_v57 }
 0x3eb   : > { %1276 = vst [vmem:[%s2357_s24 + $0x48] sm:$0xff] %v1240_v58 }
 0x3f2   : > { %v1699_v59 = vpop.f32.mrf.mxu1 }
 0x3f3   : > { %v1261_v60 = vadd.f32 %v1699_v59, %v1476_v34 }
 0x3f4   : > { %v1252_v61 = vpop.f32.mrf.mxu1 }
 0x3f5   : > { %1281 = vst [vmem:[%s2357_s24 + $0x70] sm:$0xff] %v1261_v60  ;;  %v1253_v62 = vadd.f32 %v1476_v34, %v1252_v61 }
 0x3f6   : > { %v1700_v63 = vpop.f32.mrf.mxu1 }
 0x3f7   : > { %1279 = vst [vmem:[%s2357_s24 + $0x60] sm:$0xff] %v1253_v62  ;;  %v1264_v0 = vadd.f32 %v1700_v63, %v1476_v34 }
 0x3f8   : > { %v1255_v1 = vpop.f32.mrf.mxu1 }
 0x3f9   : > { %1282 = vst [vmem:[%s2357_s24 + $0x78] sm:$0xff] %v1264_v0  ;;  %v1256_v2 = vadd.f32 %v1476_v34, %v1255_v1 }
 0x3fb   : > { %1280 = vst [vmem:[%s2357_s24 + $0x68] sm:$0xff] %v1256_v2 }
 0x3fc   : > { %2019 = shalt.err (!%p2016_p5)
}
 0x3fd   : > { %s2020_s21 = scalar_lea.hbm %s2378_s2, 2048  ;;  %s2024_s16 = scalar_lea.hbm %s2433_s8, 4096 }
 0x3fe   : > { %p2021_p3 = scmp.ne.s32.totalorder %s2378_s2, %s2020_s21  ;;  %p2025_p8 = scmp.lt.s32.totalorder %s2378_s2, %s2433_s8 }
 0x3ff   : > { %p2026_p9 = scmp.lt.s32.totalorder %s2024_s16, %s2020_s21 }
 0x400   : > { %p2022_p4 = pnand %p2021_p3, %p2454_p12 }
 0x401   : > { %p2027_p2 = por %p2026_p9, %p2025_p8 }
 0x402   : > { %p2023_p6 = pneg %p2022_p4 }
 0x404   : > { %p2028_p10 = pnand %p2027_p2, %p2023_p6 }
 0x406   : > { %2031 = shalt.err (!%p2028_p10)
}
 0x407   : > { %s2090_s10 = smov 128   ;;  %s2091_s23 = smov 8  }
 0x408   : > { %1735 = dma.vmem_to_hbm [thread:$0]  (%p2454_p12), %s2380_s22, 2048, %s2378_s2, %s1284_s19, %s2090_s10, %s2090_s10, %s2091_s23  }
 0x409 PF: > { %s1312_s9 = sand.u32 1, %s2066_s27   ;;  %p2455_p7 = scmp.ne.s32.totalorder %s2441_s12, 0 }
 0x40a   : > { %p2456_p1 = scmp.ge.s32.totalorder %s2078_s30, 2  ;;  %s1313_s18 = scalar_lea.sflag [#allocation4], %s1312_s9 }
 0x40c   : > { %p1755_p13 = pnand %p2456_p1, %p2455_p7 }
 0x40e   : > { %p1756_p0 = pneg %p1755_p13 }
 0x410   : > { %2061 = dma.done.wait (%p1756_p0), %s1313_s18, 2048  }
 0x411   : > { %2063 = vsyncadd (%p1756_p0), %s1313_s18, 4294965248  ;;  %p23_p11 = scmp.ge.s32.totalorder %s2237_s26, 4   ;;  %s2457_s27 = smov %s2070_s28 }
 0x412   : > { %s2458_s28 = smov %s2074_s29  ;;  %s2459_s29 = smov %s2253_s15 }
 0x413   : > { %s2460_s30 = smov %s2237_s26  ;;  %25 = sbr.rel (!%p23_p11) target bundleno = 10 (0xa), region = 113 }
 0x418   :  { %1318 = vsyncpa [#allocation3], 1 }
 0x419   :  { %1320 = vsyncpa [#allocation3 + $0x1], 1 }
 0x41a   :  { %1321 = vsyncpa [#allocation6], 1 }
 0x41b   :  { %1322 = vsyncpa [#allocation9], 1 }
 0x41c   :  { %1323 = vsyncpa [#allocation4], 1 }
 0x41d   :  { %1325 = vsyncpa [#allocation4 + $0x1], 1 }

</bundles_post_ra>
